<compile_context>
chip_gen: v5e
topology: v5e:2x2
jax: 0.10.0
libtpu: 0.0.40
codegen_flags: <defaults>
</compile_context>

<pallas_src>
import jax
import jax.numpy as jnp
from jax.experimental import pallas as pl
from jax.experimental.pallas import tpu as pltpu

LANES = 128
_TARGET_BLOCK_BYTES = 4 * 1024 * 1024      # per pipeline buffer
_VMEM_LIMIT_BYTES = 32 * 1024 * 1024       # headroom for 4 x 4 MiB buffers everywhere
_MIN_PALLAS_BYTES = 64 * 1024              # below this, jnp.tanh beats kernel launch
_MIN_GRID_STEPS = 4                        # guarantee pipelining + dual-TC work

# Tri-state cache: None = not probed yet, True/False = core_parallel supported.
_CORE_PARALLEL_OK = None


def _round_up(x: int, m: int) -> int:
    return ((x + m - 1) // m) * m


def _sublane_multiple(dtype) -> int:
    # Sub-32-bit dtypes pack along sublanes: f32 -> 8, bf16 -> 16, int8/fp8 -> 32.
    itemsize = jnp.dtype(dtype).itemsize
    return 8 * max(1, 4 // itemsize)


def _tanh_kernel(x_ref, o_ref):
    # Elementwise tanh on the current (block_rows, 128) VMEM tile (EUP path).
    o_ref[...] = jnp.tanh(x_ref[...])


def _run_tanh(x2d, block_rows, grid, semantics):
    rows, lanes = x2d.shape
    nelem = rows * lanes
    itemsize = jnp.dtype(x2d.dtype).itemsize
    return pl.pallas_call(
        _tanh_kernel,
        out_shape=jax.ShapeDtypeStruct((rows, lanes), x2d.dtype),
        grid=grid,
        in_specs=[pl.BlockSpec((block_rows, lanes), lambda i: (i, 0))],
        out_specs=pl.BlockSpec((block_rows, lanes), lambda i: (i, 0)),
        compiler_params=pltpu.CompilerParams(
            dimension_semantics=(semantics,),
            vmem_limit_bytes=_VMEM_LIMIT_BYTES,
        ),
        cost_estimate=pl.CostEstimate(
            flops=0,
            transcendentals=nelem,
            bytes_accessed=2 * nelem * itemsize,
        ),
    )(x2d)


def _tanh_2d(x2d: jnp.ndarray) -> jnp.ndarray:
    """Run the tanh kernel over a (rows, 128) lane-dense slab."""
    global _CORE_PARALLEL_OK

    rows, lanes = x2d.shape
    dtype = x2d.dtype
    itemsize = jnp.dtype(dtype).itemsize
    sub = _sublane_multiple(dtype)

    # ~4 MiB per pipeline buffer; 2 in + 2 out buffers = 16 MiB, within the
    # explicit 32 MiB scoped-VMEM limit on v5e/v6e/v7x.
    block_rows = max(sub, (_TARGET_BLOCK_BYTES // (lanes * itemsize)) // sub * sub)

    # Never emit a 1-block grid for sizeable inputs: cap the block so there are
    # at least ~_MIN_GRID_STEPS grid steps (pipelining + both TCs on v7x).
    rows_per_step = max(sub, _round_up(pl.cdiv(rows, _MIN_GRID_STEPS), sub))
    block_rows = min(block_rows, rows_per_step)

    if block_rows >= rows:
        # Genuinely tiny slab (shouldn't happen above the launch cutoff): one
        # full-array block, exempt from the (8,128) divisibility rule.
        block_rows = rows
        grid = (1,)
    else:
        grid = (pl.cdiv(rows, block_rows),)  # partial last block is masked

    # Prefer CORE_PARALLEL (real dual-TC sharding on v7x); fall back to PARALLEL
    # if this jax/chip combination rejects it. Probe result is cached.
    prefer_core = _CORE_PARALLEL_OK is not False
    semantics = pltpu.CORE_PARALLEL if prefer_core else pltpu.PARALLEL
    try:
        out = _run_tanh(x2d, block_rows, grid, semantics)
        if prefer_core and _CORE_PARALLEL_OK is None:
            out = jax.block_until_ready(out)  # surface any async failure once
            _CORE_PARALLEL_OK = True
        return out
    except Exception:
        if not prefer_core:
            raise
        _CORE_PARALLEL_OK = False
        return _run_tanh(x2d, block_rows, grid, pltpu.PARALLEL)


def feedback_scale(x: jnp.ndarray, mode: str = "tanh") -> jnp.ndarray:
    """Pallas implementation of FeedbackScale.forward.

    mode == 'tanh'  -> elementwise tanh (Pallas kernel for large inputs)
    otherwise       -> identity (no kernel launch)
    """
    if mode != "tanh":
        return x

    orig_shape = x.shape
    n = x.size
    itemsize = jnp.dtype(x.dtype).itemsize

    # Tiny tensors: pallas_call launch/DMA-setup overhead dominates; let XLA's
    # fused tanh handle it.
    if n == 0 or n * itemsize < _MIN_PALLAS_BYTES:
        return jnp.tanh(x)

    if n % LANES == 0:
        # Fast path: free reshape to a lane-dense slab, no padding, no extra passes.
        y2d = _tanh_2d(x.reshape(n // LANES, LANES))
        return y2d.reshape(orig_shape)

    # Non-128-aligned element count: kernel on the 128-aligned prefix, plain
    # jnp.tanh on the <128-element tail, then stitch (no full-array pad/slice).
    flat = x.reshape(-1)
    n_main = (n // LANES) * LANES
    y_main = _tanh_2d(flat[:n_main].reshape(n_main // LANES, LANES)).reshape(-1)
    y_tail = jnp.tanh(flat[n_main:])
    return jnp.concatenate([y_main, y_tail]).reshape(orig_shape)


if __name__ == "__main__":
    key = jax.random.PRNGKey(0)

    # Tiny NCHW input consistent with the module's conv-style usage: goes
    # through the small-input (jnp.tanh) path by design.
    x_small = jax.random.normal(key, (2, 4, 16, 16), dtype=jnp.float32)
    y_small = jax.block_until_ready(feedback_scale(x_small, mode="tanh"))
    assert y_small.shape == x_small.shape and y_small.dtype == x_small.dtype
    assert jnp.max(jnp.abs(y_small - jnp.tanh(x_small))) < 1e-6

    # Primary kernel-exercising input (128 KiB f32 -> multi-block Pallas grid).
    x = jax.random.normal(jax.random.PRNGKey(1), (2, 4, 64, 64), dtype=jnp.float32)
    y = jax.block_until_ready(feedback_scale(x, mode="tanh"))
    assert y.shape == x.shape and y.dtype == x.dtype
    assert jnp.max(jnp.abs(y - jnp.tanh(x))) < 1e-6

    # bf16 stays bf16 end-to-end (kernel path, looser tolerance).
    xb = jax.random.normal(jax.random.PRNGKey(2), (4, 8, 64, 64)).astype(jnp.bfloat16)
    yb = jax.block_until_ready(feedback_scale(xb, mode="tanh"))
    assert yb.dtype == jnp.bfloat16
    assert jnp.max(jnp.abs(yb.astype(jnp.float32)
                           - jnp.tanh(xb.astype(jnp.float32)))) < 2e-2

    # Multi-block grid with a partial last block.
    xm = jax.random.normal(jax.random.PRNGKey(3), (4160, 128), dtype=jnp.float32)
    ym = jax.block_until_ready(feedback_scale(xm, mode="tanh"))
    assert jnp.max(jnp.abs(ym - jnp.tanh(xm))) < 1e-6

    # Non-128-aligned element count exercises the prefix+tail path.
    xo = jax.random.normal(jax.random.PRNGKey(4), (3, 5, 67, 67), dtype=jnp.float32)
    yo = jax.block_until_ready(feedback_scale(xo, mode="tanh"))
    assert yo.shape == xo.shape
    assert jnp.max(jnp.abs(yo - jnp.tanh(xo))) < 1e-6

    # Identity mode (no kernel needed).
    y_id = jax.block_until_ready(feedback_scale(x_small, mode="none"))
    assert jnp.array_equal(y_id, x_small)

    print("KERNEL_OK")
</pallas_src>

<mosaic_0001>
module attributes {stable_mosaic.version = 11 : i64} {
  func.func @_tanh_kernel(%arg0: i32, %arg1: memref<64x128xf32, #tpu.memory_space<vmem>>, %arg2: memref<64x128xf32, #tpu.memory_space<vmem>>) attributes {dimension_semantics = [#tpu.dimension_semantics<core_parallel>], iteration_bounds = array<i64: 4>, scalar_prefetch = 0 : i64, scratch_operands = 0 : i64, tpu.core_type = #tpu.core_type<tc>, window_params = [{transform_indices = @transform_0, window_bounds = array<i64: 64, 128>}, {transform_indices = @transform_1, window_bounds = array<i64: 64, 128>}]} {
    %c0 = arith.constant 0 : index
    %c0_0 = arith.constant 0 : index
    %0 = vector.load %arg1[%c0, %c0_0] : memref<64x128xf32, #tpu.memory_space<vmem>>, vector<64x128xf32>
    %1 = math.tanh %0 : vector<64x128xf32>
    %c0_1 = arith.constant 0 : index
    %c0_2 = arith.constant 0 : index
    %2 = vector.load %arg2[%c0_1, %c0_2] : memref<64x128xf32, #tpu.memory_space<vmem>>, vector<64x128xf32>
    tpu.vector_store %arg2[%c0_1, %c0_2], %1 {strides = array<i32>} : memref<64x128xf32, #tpu.memory_space<vmem>>, vector<64x128xf32>,
    return
  }
  func.func @transform_0(%arg0: i32) -> (i32, i32) {
    %c0_i32 = arith.constant 0 : i32
    %c0_i32_0 = arith.constant 0 : i32
    return %arg0, %c0_i32 : i32, i32
  }
  func.func @transform_1(%arg0: i32) -> (i32, i32) {
    %c0_i32 = arith.constant 0 : i32
    %c0_i32_0 = arith.constant 0 : i32
    return %arg0, %c0_i32 : i32, i32
  }
}

module attributes {stable_mosaic.version = 11 : i64} {
  func.func @_tanh_kernel(%arg0: i32, %arg1: memref<64x128xf32, #tpu.memory_space<vmem>>, %arg2: memref<64x128xf32, #tpu.memory_space<vmem>>) attributes {dimension_semantics = [#tpu.dimension_semantics<parallel>], iteration_bounds = array<i64: 4>, scalar_prefetch = 0 : i64, scratch_operands = 0 : i64, tpu.core_type = #tpu.core_type<tc>, window_params = [{transform_indices = @transform_0, window_bounds = array<i64: 64, 128>}, {transform_indices = @transform_1, window_bounds = array<i64: 64, 128>}]} {
    %c0 = arith.constant 0 : index
    %c0_0 = arith.constant 0 : index
    %0 = vector.load %arg1[%c0, %c0_0] : memref<64x128xf32, #tpu.memory_space<vmem>>, vector<64x128xf32>
    %1 = math.tanh %0 : vector<64x128xf32>
    %c0_1 = arith.constant 0 : index
    %c0_2 = arith.constant 0 : index
    %2 = vector.load %arg2[%c0_1, %c0_2] : memref<64x128xf32, #tpu.memory_space<vmem>>, vector<64x128xf32>
    tpu.vector_store %arg2[%c0_1, %c0_2], %1 {strides = array<i32>} : memref<64x128xf32, #tpu.memory_space<vmem>>, vector<64x128xf32>,
    return
  }
  func.func @transform_0(%arg0: i32) -> (i32, i32) {
    %c0_i32 = arith.constant 0 : i32
    %c0_i32_0 = arith.constant 0 : i32
    return %arg0, %c0_i32 : i32, i32
  }
  func.func @transform_1(%arg0: i32) -> (i32, i32) {
    %c0_i32 = arith.constant 0 : i32
    %c0_i32_0 = arith.constant 0 : i32
    return %arg0, %c0_i32 : i32, i32
  }
}

</mosaic_0001>

<bundles_post_ra>
// kernel: tpu_custom_call.1
= control target key start
LH: loop header
LB: loop body
LE: loop exit
PB: predicated region body
PF: predicated region fallthrough
CT: control target
= control target key end

     0   :  { %6 = vsyncpa [#allocation3], 0  ;;  %s571_s0 = inlined_call_operand.hbm [shape: f32[256,128], index: 0, kind: input, shape index: {}]   ;;  %s572_s1 = inlined_call_operand.hbm [shape: f32[256,128], index: 1, kind: output, shape index: {}]  }
   0x1   :  { %8 = vsyncpa [#allocation3 + $0x1], 0 }
   0x2   :  { %9 = vsyncpa [#allocation4], 0 }
   0x3   :  { %11 = vsyncpa [#allocation4 + $0x1], 0  ;;  %s446_s6 = smov 0   ;;  %s448_s7 = smov 0  }
   0x4   :  { %s450_s8 = smov 0   ;;  %s452_s9 = smov 0  }
   0x5 LB: > { %s467_s10 = sadd.s32 4294967295, %s430_s9   ;;  %s252_s11 = sadd.s32 4294967294, %s430_s9   ;;  %s430_s9 = sphi %s452_s9, %s581_s9   ;;  %s426_s8 = sphi %s450_s8, %s580_s8   ;;  %s422_s7 = sphi %s448_s7, %s579_s7   ;;  %s418_s6 = sphi %s446_s6, %s578_s6  }
   0x6   : > { %s471_s12 = sadd.s32 1, %s430_s9   ;;  %s24_s13 = sadd.s32 1, %s426_s8 }
   0x7   : > { %s21_s14 = ssub.s32 %s430_s9, %s471_s12  ;;  %p31_p0 = scmp.ne.s32.totalorder %s426_s8, %s422_s7 }
   0x8   : > { %p22_p1 = scmp.eq.s32.totalorder %s21_s14, 0  ;;  %p32_p2 = scmp.eq.s32.totalorder %s430_s9, 0 }
   0x9   : > { %p37_p3 = scmp.ne.s32.totalorder %s422_s7, %s418_s6  ;;  %p38_p4 = scmp.eq.s32.totalorder %s467_s10, 0 }
   0xa   : > { %s483_s15 = scalar_select %p22_p1, %s426_s8, %s24_s13  }
   0xb   : > { %p485_p5 = por %p32_p2, %p31_p0  ;;  %p489_p6 = por %p38_p4, %p37_p3 }
   0xc   : > { %p61_p7 = scmp.eq.s32.totalorder %s467_s10, 3  ;;  %p67_p8 = scmp.eq.s32.totalorder %s252_s11, 3 }
   0xd   : > { %p280_p9 = scmp.lt.s32.totalorder %s430_s9, 4  ;;  %s87_s20 = sand.u32 1, %s426_s8  }
   0xe   : > { %p495_p10 = por %p61_p7, %p31_p0  ;;  %p499_p11 = por %p67_p8, %p37_p3 }
   0xf   : > { %s266_s21 = sshll.u32 %s430_s9, 6  ;;  %s255_s22 = sshll.u32 %s87_s20, 6 }
  0x10   : > { %s96_s25 = scalar_lea.hbm %s571_s0, %s266_s21  ;;  %s91_s27 = scalar_lea.vmem [#allocation2], %s255_s22 }
  0x11   : > { %s97_s26 = sshll.u32 %s96_s25, 4  ;;  %s99_s28 = sshll.u32 %s91_s27, 4  ;;  %s98_s26 = int_to_ptr.hbm [resolvable:$true] %s97_s26  ;;  %s100_s28 = int_to_ptr.vmem [resolvable:$true] %s99_s28 }
  0x12   : > { %p510_p12 = pnand %p280_p9, %p485_p5  ;;  %p258_p13 = scmp.ge.s32.totalorder %s430_s9, 1 }
  0x13   : > { %p107_p0 = scmp.lt.s32.totalorder %s430_s9, 5  ;;  %s88_s30 = scalar_lea.sflag [#allocation3], %s87_s20 }
  0x14   : > { %s334_s2 = sshra.s32 %s98_s26, 4  ;;  %p338_p2 = pneg %p510_p12  ;;  %s335_s2 = int_to_ptr.hbm [resolvable:$true] %s334_s2 }
  0x15   : > { %s336_s3 = scalar_lea.hbm %s335_s2, 64  ;;  %s341_s11 = scalar_lea.hbm %s571_s0, 256 }
  0x16   : > { %p337_p1 = scmp.ne.s32.totalorder %s335_s2, %s336_s3  ;;  %p342_p5 = scmp.lt.s32.totalorder %s335_s2, %s571_s0 }
  0x17   : > { %p343_p7 = scmp.lt.s32.totalorder %s341_s11, %s336_s3 }
  0x18   : > { %p339_p3 = pnand %p338_p2, %p337_p1 }
  0x19   : > { %p344_p8 = por %p343_p7, %p342_p5 }
  0x1a   : > { %p340_p4 = pneg %p339_p3 }
  0x1c   : > { %p345_p9 = pnand %p344_p8, %p340_p4 }
  0x1e   : > { %348 = shalt.err (!%p345_p9)
}
  0x1f   : > { %s432_s16 = smov 128   ;;  %s433_s20 = smov 8  }
  0x20   : > { %275 = dma.hbm_to_vmem [thread:$0]  (!%p510_p12), %s98_s26, 1024, %s100_s28, %s88_s30, %s432_s16, %s432_s16, %s433_s20  }
  0x21   : > { %p108_p1 = pnand %p258_p13, %p107_p0 }
  0x22   : > { %s531_s21 = sand.u32 (!%p108_p1), 1, %s422_s7  }
  0x23   : > { %111 = sbr.rel (%p108_p1) target bundleno = 60 (0x3c), region = 24  ;;  %s259_s22 = sshll.u32 (!%p108_p1), %s531_s21, 6 }
  0x24   : > { %s114_s23 = scalar_lea.sflag (!%p108_p1), [#allocation3], %s531_s21  ;;  %s117_s24 = scalar_lea.vmem (!%p108_p1), [#allocation2], %s259_s22 }
  0x28   : > { %409 = dma.done.wait (%p489_p6), %s114_s23, 1024  }
  0x29   : > { %411 = vsyncadd (%p489_p6), %s114_s23, 4294966272  ;;  %v139_v0 = vld [vmem:[%s117_s24] sm:$0xff]  ;;  %v140_v1 = vld [vmem:[%s117_s24 + $0x8] sm:$0xff]  ;;  %s267_s25 = sshll.u32 %s467_s10, 6  ;;  %s136_s28 = scalar_lea.vmem [#allocation5], %s259_s22 }
  0x2a   : > { %v141_v2 = vld [vmem:[%s117_s24 + $0x10] sm:$0xff]  ;;  %318 = vtanh.f32 %v139_v0  ;;  %v142_v3 = vld [vmem:[%s117_s24 + $0x18] sm:$0xff]  ;;  %v143_v4 = vld [vmem:[%s117_s24 + $0x20] sm:$0xff]  ;;  %s175_s27 = scalar_lea.hbm %s572_s1, %s267_s25  ;;  %s176_s29 = sshll.u32 %s136_s28, 4  ;;  %s177_s29 = int_to_ptr.vmem [resolvable:$true] %s176_s29 }
  0x2b   : > { %320 = vtanh.f32 %v140_v1  ;;  %v144_v5 = vld [vmem:[%s117_s24 + $0x28] sm:$0xff]  ;;  %v145_v6 = vld [vmem:[%s117_s24 + $0x30] sm:$0xff]  ;;  %v146_v7 = vld [vmem:[%s117_s24 + $0x38] sm:$0xff]  ;;  %s178_s10 = sshll.u32 %s175_s27, 4  ;;  %s164_s30 = scalar_lea.sflag [#allocation4], %s531_s21  ;;  %s179_s10 = int_to_ptr.hbm [resolvable:$true] %s178_s10 }
  0x2c   : > { %322 = vtanh.f32 %v141_v2  ;;  %s378_s2 = sshra.s32 %s179_s10, 4  ;;  %s384_s11 = scalar_lea.hbm %s572_s1, 256  ;;  %s379_s2 = int_to_ptr.hbm [resolvable:$true] %s378_s2 }
  0x2d   : > { %324 = vtanh.f32 %v142_v3  ;;  %s380_s3 = scalar_lea.hbm %s379_s2, 64  ;;  %p385_p0 = scmp.lt.s32.totalorder %s379_s2, %s572_s1 }
  0x2e   : > { %326 = vtanh.f32 %v143_v4  ;;  %p381_p6 = scmp.ne.s32.totalorder %s379_s2, %s380_s3  ;;  %p386_p2 = scmp.lt.s32.totalorder %s384_s11, %s380_s3 }
  0x2f   : > { %328 = vtanh.f32 %v144_v5 }
  0x30   : > { %v319_v8 = vpop.eup %318  ;;  %330 = vtanh.f32 %v145_v6  ;;  %p382_p12 = pnand %p381_p6, %p495_p10  ;;  %p387_p3 = por %p386_p2, %p385_p0 }
  0x31   : > { %v321_v9 = vpop.eup %320  ;;  %155 = vst [vmem:[%s136_s28] sm:$0xff] %v319_v8  ;;  %332 = vtanh.f32 %v146_v7 }
  0x32   : > { %v323_v10 = vpop.eup %322  ;;  %156 = vst [vmem:[%s136_s28 + $0x8] sm:$0xff] %v321_v9  ;;  %p383_p13 = pneg %p382_p12 }
  0x33   : > { %v325_v11 = vpop.eup %324  ;;  %157 = vst [vmem:[%s136_s28 + $0x10] sm:$0xff] %v323_v10 }
  0x34   : > { %v327_v12 = vpop.eup %326  ;;  %158 = vst [vmem:[%s136_s28 + $0x18] sm:$0xff] %v325_v11  ;;  %p388_p4 = pnand %p387_p3, %p383_p13 }
  0x35   : > { %v329_v13 = vpop.eup %328  ;;  %159 = vst [vmem:[%s136_s28 + $0x20] sm:$0xff] %v327_v12 }
  0x36   : > { %v331_v14 = vpop.eup %330  ;;  %160 = vst [vmem:[%s136_s28 + $0x28] sm:$0xff] %v329_v13 }
  0x37   : > { %v333_v15 = vpop.eup %332  ;;  %161 = vst [vmem:[%s136_s28 + $0x30] sm:$0xff] %v331_v14 }
  0x38   : > { %162 = vst [vmem:[%s136_s28 + $0x38] sm:$0xff] %v333_v15 }
  0x39   : > { %391 = shalt.err (!%p388_p4)
}
  0x3a   : > { %s434_s16 = smov 128   ;;  %s435_s20 = smov 8  }
  0x3b   : > { %270 = dma.vmem_to_hbm [thread:$0]  (%p495_p10), %s177_s29, 1024, %s179_s10, %s164_s30, %s434_s16, %s434_s16, %s435_s20  }
  0x3c PF: > { %p281_p5 = scmp.ge.s32.totalorder %s430_s9, 2  ;;  %s193_s21 = sand.u32 1, %s418_s6  }
  0x3d   : > { %s194_s22 = scalar_lea.sflag [#allocation4], %s193_s21 }
  0x3e   : > { %p277_p7 = pnand %p281_p5, %p499_p11 }
  0x40   : > { %p278_p8 = pneg %p277_p7 }
  0x42   : > { %413 = dma.done.wait (%p278_p8), %s194_s22, 1024  }
  0x43   : > { %415 = vsyncadd (%p278_p8), %s194_s22, 4294966272  ;;  %p14_p9 = scmp.ge.s32.totalorder %s471_s12, 6   ;;  %s578_s6 = smov %s422_s7 }
  0x44   : > { %s579_s7 = smov %s426_s8  ;;  %s580_s8 = smov %s483_s15 }
  0x45   : > { %s581_s9 = smov %s471_s12  ;;  %16 = sbr.rel (!%p14_p9) target bundleno = 5 (0x5), region = 69 }
  0x4a   :  { %200 = vsyncpa [#allocation3], 1 }
  0x4b   :  { %202 = vsyncpa [#allocation3 + $0x1], 1 }
  0x4c   :  { %203 = vsyncpa [#allocation4], 1 }
  0x4d   :  { %205 = vsyncpa [#allocation4 + $0x1], 1 }

</bundles_post_ra>
